<compile_context>
chip_gen: v6e
topology: v6e:2x2x1
jax: 0.10.0
libtpu: 0.0.40
codegen_flags: <defaults>
</compile_context>

<pallas_src>
import jax
import jax.numpy as jnp
from jax.experimental import pallas as pl
from jax.experimental.pallas import tpu as pltpu


# ---------------------------------------------------------------------------
# Kernel: one grid step covers a block of batch elements (usually all of them).
# ---------------------------------------------------------------------------
def _intra_decoder_attn_kernel(
    len_ref,      # SMEM (1,) int32 : number of valid history rows (masked softmax)
    prev_s_ref,   # (Bb, Tm, Hp) f32 : decoder-state history (lane-padded)
    x_ref,        # (Bb, Kc)     f32 : [s_t | sum_k_emb | 1 | 0...] (affine-augmented)
    w_prev_ref,   # (Hp, Hp)     bf16/f32 : W_prev^T (padded)
    w_cat_ref,    # (Kc, Hp)     bf16/f32 : [W_s^T ; W_t^T ; b_s+b_t ; 0...] (fused)
    v_ref,        # (1, Hp)      f32 : v (lane-dense row, padded)
    ct_ref,       # (Bb, Hp)     f32 : output context vectors
):
    Bb, Tm, Hp = prev_s_ref.shape
    prev_s = prev_s_ref[...]                                        # (Bb, Tm, Hp)
    w_prev = w_prev_ref[...].astype(jnp.float32)                    # up-cast bf16 weights
    w_cat = w_cat_ref[...].astype(jnp.float32)

    # et = W_prev(prev_s): one (Bb*Tm, Hp)@(Hp, Hp) MXU push. The reshape is layout-free
    # (Tm is a multiple of 8 sublanes, Hp a multiple of 128 lanes).
    et = jnp.dot(prev_s.reshape(Bb * Tm, Hp), w_prev,
                 preferred_element_type=jnp.float32)                # (Bb*Tm, Hp)

    # Fused W_s(s_t) + W_t(sum_k_emb) + (b_s + b_t): one (Bb, Kc)@(Kc, Hp) push,
    # bias comes out of the matmul via the augmented "1" column of x.
    dec_fea = jnp.dot(x_ref[...], w_cat,
                      preferred_element_type=jnp.float32)           # (Bb, Hp)

    et = jnp.tanh(et.reshape(Bb, Tm, Hp) + dec_fea[:, None, :])     # (Bb, Tm, Hp)

    # v-projection as VPU multiply + lane reduce (no N=1 MXU matmul, no relayout).
    scores = jnp.sum(et * v_ref[...], axis=2)                       # (Bb, Tm)

    # Masked softmax over the Tm history rows (rows >= valid length are excluded).
    t_ids = jax.lax.broadcasted_iota(jnp.int32, (Bb, Tm), 1)
    valid = t_ids < len_ref[0]
    scores = jnp.where(valid, scores, jnp.float32(-1e30))
    m = jnp.max(scores, axis=1, keepdims=True)                      # (Bb, 1)
    e = jnp.where(valid, jnp.exp(scores - m), 0.0)                  # (Bb, Tm)
    denom = jnp.sum(e, axis=1, keepdims=True)                       # (Bb, 1)
    at = e / denom                                                  # exact divide

    # ct_d = at @ prev_s per batch element: broadcast multiply + sublane reduce.
    ct = jnp.sum(at[:, :, None] * prev_s, axis=1)                   # (Bb, Hp)
    ct_ref[...] = ct.astype(ct_ref.dtype)


_VMEM_HISTORY_BUDGET = 4 << 20  # bytes of f32 history per grid step (double-buffered)


def _run_attn_kernel(length, prev_s_p, x_p, w_prev_p, w_cat_p, v_p):
    B, Tm, Hp = prev_s_p.shape
    Kc = x_p.shape[-1]

    # Batch blocking: one grid step covers as many batch elements as fit the budget.
    # At decode sizes this collapses to a single grid step (no per-step overhead).
    if B * Tm * Hp * 4 <= _VMEM_HISTORY_BUDGET:
        b_blk, n_steps = B, 1
    else:
        b_blk = max(8, (_VMEM_HISTORY_BUDGET // (Tm * Hp * 4)) // 8 * 8)
        n_steps = pl.cdiv(B, b_blk)
    b_pad = b_blk * n_steps
    if b_pad != B:
        prev_s_p = _pad_axis(prev_s_p, 0, b_pad)
        x_p = _pad_axis(x_p, 0, b_pad)

    # Only request the megacore split when there are enough real steps per core;
    # otherwise it just doubles the weight DMA on v7x for no compute win.
    sem = ("parallel",) if n_steps >= 4 else ("arbitrary",)

    out = pl.pallas_call(
        _intra_decoder_attn_kernel,
        out_shape=jax.ShapeDtypeStruct((b_pad, Hp), jnp.float32),
        grid_spec=pltpu.PrefetchScalarGridSpec(
            num_scalar_prefetch=1,                  # valid-length scalar -> SMEM
            grid=(n_steps,),
            in_specs=[
                pl.BlockSpec((b_blk, Tm, Hp), lambda i, L: (i, 0, 0)),  # history block
                pl.BlockSpec((b_blk, Kc), lambda i, L: (i, 0)),         # [s_t|kemb|1]
                pl.BlockSpec((Hp, Hp), lambda i, L: (0, 0)),            # weights: resident
                pl.BlockSpec((Kc, Hp), lambda i, L: (0, 0)),
                pl.BlockSpec((1, Hp), lambda i, L: (0, 0)),
            ],
            out_specs=pl.BlockSpec((b_blk, Hp), lambda i, L: (i, 0)),
        ),
        compiler_params=pltpu.CompilerParams(dimension_semantics=sem),
    )(length, prev_s_p, x_p, w_prev_p, w_cat_p, v_p)
    return out[:B]


# ---------------------------------------------------------------------------
# Wrapper-side layout prep (done once per model, not per decode step).
# ---------------------------------------------------------------------------
def _round_up(n, m):
    return ((n + m - 1) // m) * m


def _pad_axis(x, axis, target):
    pad = target - x.shape[axis]
    if pad == 0:
        return x
    widths = [(0, 0)] * x.ndim
    widths[axis] = (0, pad)
    return jnp.pad(x, widths)


def _pad2(x, rows, cols):
    return _pad_axis(_pad_axis(x, 0, rows), 1, cols)


def prepare_params(params, key_attention=True, weights_dtype=jnp.bfloat16):
    """Fuse + pad the Linear weights once.

    Weights are stored pre-transposed (PyTorch Linear: y = x @ W^T + b) and, by default,
    in bf16 (halves weight DMA/VMEM; matmuls still accumulate in f32 in-kernel).
    Output lanes are padded to a multiple of 128; contraction rows of the fused
    [W_s;W_t;bias] matrix only to a multiple of 8 (sublane dim).
    """
    H = params["W_prev_T"].shape[0]
    Hp = _round_up(H, 128)

    w_prev_p = _pad2(params["W_prev_T"], Hp, Hp).astype(weights_dtype)
    v_p = _pad_axis(params["v"].reshape(1, H), 1, Hp).astype(jnp.float32)

    # s_t-only projection (used when key_attention is off / batch sizes mismatch,
    # mirroring the PyTorch module's silent skip of the k_t term). Bias folded in as
    # one extra contraction row (x gets a trailing 1).
    w_s_aug = jnp.concatenate([params["W_s_T"], params["b_s"]], axis=0)        # (H+1, H)
    Kc_s = _round_up(w_s_aug.shape[0], 8)
    w_s_p = _pad2(w_s_aug, Kc_s, Hp).astype(weights_dtype)

    prep = {
        "H": H, "Hp": Hp,
        "key_attention": bool(key_attention),
        "w_prev_p": w_prev_p, "v_p": v_p,
        "w_s_p": w_s_p, "Kc_s": Kc_s,
    }

    if key_attention:
        w_sk_aug = jnp.concatenate(
            [params["W_s_T"], params["W_t_T"], params["b_s"] + params["b_t"]], axis=0)
        Kc_sk = _round_up(w_sk_aug.shape[0], 8)
        prep["w_sk_p"] = _pad2(w_sk_aug, Kc_sk, Hp).astype(weights_dtype)
        prep["Kc_sk"] = Kc_sk
    return prep


def _build_x(s_t, sum_k_emb, prep):
    """Affine-augmented input row: [s_t | sum_k_emb | 1 | 0...] (or [s_t | 1 | 0...])."""
    B = s_t.shape[0]
    ones = jnp.ones((B, 1), s_t.dtype)
    use_key = (prep["key_attention"] and sum_k_emb is not None
               and sum_k_emb.shape[0] == B)                    # static check, as in module
    if use_key:
        x = jnp.concatenate([s_t, sum_k_emb, ones], axis=1)
        return _pad_axis(x, 1, prep["Kc_sk"]), prep["w_sk_p"]
    x = jnp.concatenate([s_t, ones], axis=1)
    return _pad_axis(x, 1, prep["Kc_s"]), prep["w_s_p"]


# ---------------------------------------------------------------------------
# Module-faithful forward (grows prev_s by one each call, like the PyTorch module).
# ---------------------------------------------------------------------------
def decoder_attention_forward(s_t, prev_s, sum_k_emb, prep, intra_decoder=True):
    """Mirrors decoder_attention.forward. Returns (ct_d, new_prev_s)."""
    if not intra_decoder:
        return jnp.zeros_like(s_t), prev_s
    if prev_s is None:
        return jnp.zeros_like(s_t), s_t[:, None, :]

    B, T, H = prev_s.shape
    x_p, w_cat_p = _build_x(s_t, sum_k_emb, prep)
    prev_s_p = _pad_axis(prev_s, 2, prep["Hp"])                # (B, T, Hp)
    length = jnp.array([T], dtype=jnp.int32)                   # all T rows valid

    ct_p = _run_attn_kernel(length, prev_s_p, x_p,
                            prep["w_prev_p"], w_cat_p, prep["v_p"])
    ct_d = ct_p[:, :H]

    # Module-faithful O(T) history growth; for decoding loops prefer the cached API
    # below, which updates a pre-padded cache in place (no O(T^2) HBM traffic).
    new_prev_s = jnp.concatenate([prev_s, s_t[:, None, :]], axis=1)
    return ct_d, new_prev_s


# ---------------------------------------------------------------------------
# Cached decode-step API: pre-padded in-place history + masked softmax.
# ---------------------------------------------------------------------------
def init_decoder_cache(batch, t_max, prep, dtype=jnp.float32):
    # t_max kept a multiple of 8 so the in-kernel (B,T,Hp)->(B*T,Hp) reshape is layout-free.
    t_max = _round_up(t_max, 8)
    return jnp.zeros((batch, t_max, prep["Hp"]), dtype), 0


def decoder_attention_step_cached(s_t, sum_k_emb, cache, length, prep, intra_decoder=True):
    """One decode step against a pre-padded (B, T_max, Hp) history cache.

    `length` = number of valid rows currently in the cache (Python int).
    Returns (ct_d, new_cache, new_length).
    # TODO(synk): make `length` a traced scalar (lax.cond for the empty-history branch)
    # so a full decode loop can live under one jit.
    """
    if not intra_decoder:
        return jnp.zeros_like(s_t), cache, length

    B, T_max, Hp = cache.shape
    H = prep["H"]
    s_row = _pad_axis(s_t, 1, Hp)[:, None, :]                  # (B, 1, Hp)

    if length == 0:                                            # `prev_s is None` branch
        cache = jax.lax.dynamic_update_slice(cache, s_row, (0, 0, 0))
        return jnp.zeros_like(s_t), cache, 1

    x_p, w_cat_p = _build_x(s_t, sum_k_emb, prep)
    len_arr = jnp.array([length], dtype=jnp.int32)
    ct_p = _run_attn_kernel(len_arr, cache, x_p,
                            prep["w_prev_p"], w_cat_p, prep["v_p"])
    ct_d = ct_p[:, :H]

    cache = jax.lax.dynamic_update_slice(cache, s_row, (0, length, 0))
    return ct_d, cache, length + 1


# ---------------------------------------------------------------------------
# Pure-JAX reference (matches PyTorch semantics) for validation.
# ---------------------------------------------------------------------------
def _reference_forward(s_t, prev_s, sum_k_emb, p, key_attention=True):
    et = prev_s @ p["W_prev_T"]
    dec_fea = s_t @ p["W_s_T"] + p["b_s"][0]
    et = et + dec_fea[:, None, :]
    if key_attention and sum_k_emb.shape[0] == prev_s.shape[0]:
        k_t = sum_k_emb @ p["W_t_T"] + p["b_t"][0]
        et = et + k_t[:, None, :]
    et = jnp.tanh(et)
    scores = (et @ p["v"])[..., 0]                             # (B, T)
    at = jax.nn.softmax(scores, axis=1)
    ct_d = jnp.einsum("bt,bth->bh", at, prev_s)
    new_prev_s = jnp.concatenate([prev_s, s_t[:, None, :]], axis=1)
    return ct_d, new_prev_s


if __name__ == "__main__":
    # config: hidden_dim=32, emb_dim=16; batch=2, T=8 previous decoder steps
    B, T, H, E = 2, 8, 32, 16

    key = jax.random.PRNGKey(0)
    k_st, k_prev, k_emb, k_wp, k_ws, k_bs, k_wt, k_bt, k_v = jax.random.split(key, 9)

    s_t = jax.random.normal(k_st, (B, H), dtype=jnp.float32)
    prev_s = jax.random.normal(k_prev, (B, T, H), dtype=jnp.float32)
    sum_k_emb = jax.random.normal(k_emb, (B, E), dtype=jnp.float32)

    # PyTorch Linear: y = x @ W^T + b. Weights stored pre-transposed: (in, out).
    params = {
        "W_prev_T": 0.1 * jax.random.normal(k_wp, (H, H), dtype=jnp.float32),
        "W_s_T":    0.1 * jax.random.normal(k_ws, (H, H), dtype=jnp.float32),
        "b_s":      0.1 * jax.random.normal(k_bs, (1, H), dtype=jnp.float32),
        "W_t_T":    0.1 * jax.random.normal(k_wt, (E, H), dtype=jnp.float32),
        "b_t":      0.1 * jax.random.normal(k_bt, (1, H), dtype=jnp.float32),
        "v":        0.1 * jax.random.normal(k_v, (H, 1), dtype=jnp.float32),
    }

    ct_ref, prev_ref = _reference_forward(s_t, prev_s, sum_k_emb, params)

    # --- default bf16-weight path (perf): quantization-aware tolerance ---------------
    prep_bf16 = prepare_params(params, key_attention=True)
    ct_d, new_prev_s = decoder_attention_forward(s_t, prev_s, sum_k_emb, prep_bf16)
    jax.block_until_ready(ct_d)
    jax.block_until_ready(new_prev_s)
    assert ct_d.shape == (B, H) and new_prev_s.shape == (B, T + 1, H)
    assert bool(jnp.allclose(ct_d, ct_ref, atol=5e-3, rtol=5e-3))
    assert bool(jnp.allclose(new_prev_s, prev_ref))

    # --- f32-weight path: tight check of the kernel math itself ----------------------
    prep_f32 = prepare_params(params, key_attention=True, weights_dtype=jnp.float32)
    ct32, _ = decoder_attention_forward(s_t, prev_s, sum_k_emb, prep_f32)
    jax.block_until_ready(ct32)
    assert bool(jnp.allclose(ct32, ct_ref, atol=1e-4, rtol=1e-4))

    # --- cached decode-step API (in-place history + masked softmax) ------------------
    cache, length = init_decoder_cache(B, t_max=16, prep=prep_f32)
    ref_prev = None
    for i, kk in enumerate(jax.random.split(jax.random.PRNGKey(1), 4)):
        st_i = jax.random.normal(kk, (B, H), dtype=jnp.float32)
        ct_i, cache, length = decoder_attention_step_cached(
            st_i, sum_k_emb, cache, length, prep_f32)
        jax.block_until_ready(ct_i)
        if ref_prev is None:
            ct_ref_i, ref_prev = jnp.zeros_like(st_i), st_i[:, None, :]
        else:
            ct_ref_i, ref_prev = _reference_forward(st_i, ref_prev, sum_k_emb, params)
        assert bool(jnp.allclose(ct_i, ct_ref_i, atol=1e-4, rtol=1e-4)), f"step {i}"
    assert length == 4

    # --- `prev_s is None` and intra_decoder=False branches (no kernel needed) --------
    ct0, prev0 = decoder_attention_forward(s_t, None, sum_k_emb, prep_bf16)
    jax.block_until_ready(ct0)
    assert bool(jnp.allclose(ct0, 0.0)) and prev0.shape == (B, 1, H)
    ct_off, prev_off = decoder_attention_forward(
        s_t, prev_s, sum_k_emb, prep_bf16, intra_decoder=False)
    assert bool(jnp.allclose(ct_off, 0.0)) and prev_off.shape == prev_s.shape

    print("KERNEL_OK")
</pallas_src>

<mosaic_0001>
module attributes {stable_mosaic.version = 11 : i64} {
  func.func @_intra_decoder_attn_kernel(%arg0: i32, %arg1: memref<1xi32, #tpu.memory_space<smem>>, %arg2: memref<2x8x128xf32, #tpu.memory_space<vmem>>, %arg3: memref<2x56xf32, #tpu.memory_space<vmem>>, %arg4: memref<128x128xbf16, #tpu.memory_space<vmem>>, %arg5: memref<56x128xbf16, #tpu.memory_space<vmem>>, %arg6: memref<1x128xf32, #tpu.memory_space<vmem>>, %arg7: memref<2x128xf32, #tpu.memory_space<vmem>>) attributes {dimension_semantics = [#tpu.dimension_semantics<arbitrary>], iteration_bounds = array<i64: 1>, scalar_prefetch = 1 : i64, scratch_operands = 0 : i64, tpu.core_type = #tpu.core_type<tc>, window_params = [{transform_indices = @transform_0, window_bounds = array<i64: 2, 8, 128>}, {transform_indices = @transform_1, window_bounds = array<i64: 2, 56>}, {pipeline_mode = #tpu.pipeline_mode<synchronous>, transform_indices = @transform_2, window_bounds = array<i64: 128, 128>}, {pipeline_mode = #tpu.pipeline_mode<synchronous>, transform_indices = @transform_3, window_bounds = array<i64: 56, 128>}, {pipeline_mode = #tpu.pipeline_mode<synchronous>, transform_indices = @transform_4, window_bounds = array<i64: 1, 128>}, {transform_indices = @transform_5, window_bounds = array<i64: 2, 128>}]} {
    %c0 = arith.constant 0 : index
    %c0_0 = arith.constant 0 : index
    %c0_1 = arith.constant 0 : index
    %0 = vector.load %arg2[%c0, %c0_0, %c0_1] : memref<2x8x128xf32, #tpu.memory_space<vmem>>, vector<2x8x128xf32>
    %c0_2 = arith.constant 0 : index
    %c0_3 = arith.constant 0 : index
    %1 = vector.load %arg4[%c0_2, %c0_3] : memref<128x128xbf16, #tpu.memory_space<vmem>>, vector<128x128xbf16>
    %2 = arith.extf %1 : vector<128x128xbf16> to vector<128x128xf32>
    %c0_4 = arith.constant 0 : index
    %c0_5 = arith.constant 0 : index
    %3 = vector.load %arg5[%c0_4, %c0_5] : memref<56x128xbf16, #tpu.memory_space<vmem>>, vector<56x128xbf16>
    %4 = arith.extf %3 : vector<56x128xbf16> to vector<56x128xf32>
    %5 = vector.shape_cast %0 : vector<2x8x128xf32> to vector<16x128xf32>
    %cst = arith.constant dense<0.000000e+00> : vector<16x128xf32>
    %6 = tpu.matmul %5, %2, %cst {dimension_numbers = #tpu.dot_dimension_numbers<[1], [0], [0], [1], [0, 0, 1, 1], [], []>} : vector<16x128xf32>, vector<128x128xf32>, vector<16x128xf32> -> vector<16x128xf32>
    %c0_6 = arith.constant 0 : index
    %c0_7 = arith.constant 0 : index
    %7 = vector.load %arg3[%c0_6, %c0_7] : memref<2x56xf32, #tpu.memory_space<vmem>>, vector<2x56xf32>
    %cst_8 = arith.constant dense<0.000000e+00> : vector<2x128xf32>
    %8 = tpu.matmul %7, %4, %cst_8 {dimension_numbers = #tpu.dot_dimension_numbers<[1], [0], [0], [1], [0, 0, 1, 1], [], []>} : vector<2x56xf32>, vector<56x128xf32>, vector<2x128xf32> -> vector<2x128xf32>
    %9 = vector.shape_cast %6 : vector<16x128xf32> to vector<2x8x128xf32>
    %10 = vector.shape_cast %8 : vector<2x128xf32> to vector<2x1x128xf32>
    %11 = vector.broadcast %10 : vector<2x1x128xf32> to vector<2x8x128xf32>
    %12 = arith.addf %9, %11 : vector<2x8x128xf32>
    %13 = math.tanh %12 : vector<2x8x128xf32>
    %c0_9 = arith.constant 0 : index
    %c0_10 = arith.constant 0 : index
    %14 = vector.load %arg6[%c0_9, %c0_10] : memref<1x128xf32, #tpu.memory_space<vmem>>, vector<1x128xf32>
    %15 = vector.shape_cast %14 : vector<1x128xf32> to vector<1x1x128xf32>
    %16 = vector.broadcast %15 : vector<1x1x128xf32> to vector<2x8x128xf32>
    %17 = arith.mulf %13, %16 : vector<2x8x128xf32>
    %cst_11 = arith.constant dense<0.000000e+00> : vector<2x8xf32>
    %18 = vector.multi_reduction <add>, %17, %cst_11 [2] : vector<2x8x128xf32> to vector<2x8xf32>
    %19 = tpu.iota {dimensions = array<i32: 1>} : vector<2x8xi32>
    %c0_12 = arith.constant 0 : index
    %20 = memref.load %arg1[%c0_12] : memref<1xi32, #tpu.memory_space<smem>>
    %21 = vector.broadcast %20 : i32 to vector<2x8xi32>
    %22 = arith.cmpi slt, %19, %21 : vector<2x8xi32>
    %cst_13 = arith.constant -1.000000e+30 : f32
    %23 = vector.broadcast %cst_13 : f32 to vector<2x8xf32>
    %24 = arith.select %22, %18, %23 : vector<2x8xi1>, vector<2x8xf32>
    %cst_14 = arith.constant dense<0xFF800000> : vector<2xf32>
    %25 = vector.multi_reduction <maximumf>, %24, %cst_14 [1] : vector<2x8xf32> to vector<2xf32>
    %26 = vector.shape_cast %25 : vector<2xf32> to vector<2x1xf32>
    %27 = vector.broadcast %26 : vector<2x1xf32> to vector<2x8xf32>
    %28 = arith.subf %24, %27 : vector<2x8xf32>
    %29 = math.exp %28 : vector<2x8xf32>
    %cst_15 = arith.constant 0.000000e+00 : f32
    %30 = vector.broadcast %cst_15 : f32 to vector<2x8xf32>
    %31 = arith.select %22, %29, %30 : vector<2x8xi1>, vector<2x8xf32>
    %cst_16 = arith.constant dense<0.000000e+00> : vector<2xf32>
    %32 = vector.multi_reduction <add>, %31, %cst_16 [1] : vector<2x8xf32> to vector<2xf32>
    %33 = vector.shape_cast %32 : vector<2xf32> to vector<2x1xf32>
    %34 = vector.broadcast %33 : vector<2x1xf32> to vector<2x8xf32>
    %35 = arith.divf %31, %34 : vector<2x8xf32>
    %36 = vector.shape_cast %35 : vector<2x8xf32> to vector<2x8x1xf32>
    %37 = vector.broadcast %36 : vector<2x8x1xf32> to vector<2x8x128xf32>
    %38 = arith.mulf %37, %0 : vector<2x8x128xf32>
    %cst_17 = arith.constant dense<0.000000e+00> : vector<2x128xf32>
    %39 = vector.multi_reduction <add>, %38, %cst_17 [1] : vector<2x8x128xf32> to vector<2x128xf32>
    %c0_18 = arith.constant 0 : index
    %c0_19 = arith.constant 0 : index
    %40 = vector.load %arg7[%c0_18, %c0_19] : memref<2x128xf32, #tpu.memory_space<vmem>>, vector<2x128xf32>
    tpu.vector_store %arg7[%c0_18, %c0_19], %39 {strides = array<i32>} : memref<2x128xf32, #tpu.memory_space<vmem>>, vector<2x128xf32>,
    return
  }
  func.func @transform_0(%arg0: i32, %arg1: memref<1xi32, #tpu.memory_space<smem>>) -> (i32, i32, i32) {
    %c0_i32 = arith.constant 0 : i32
    %c0_i32_0 = arith.constant 0 : i32
    %c0_i32_1 = arith.constant 0 : i32
    return %arg0, %c0_i32, %c0_i32_0 : i32, i32, i32
  }
  func.func @transform_1(%arg0: i32, %arg1: memref<1xi32, #tpu.memory_space<smem>>) -> (i32, i32) {
    %c0_i32 = arith.constant 0 : i32
    %c0_i32_0 = arith.constant 0 : i32
    return %arg0, %c0_i32 : i32, i32
  }
  func.func @transform_2(%arg0: i32, %arg1: memref<1xi32, #tpu.memory_space<smem>>) -> (i32, i32) {
    %c0_i32 = arith.constant 0 : i32
    %c0_i32_0 = arith.constant 0 : i32
    %c0_i32_1 = arith.constant 0 : i32
    return %c0_i32, %c0_i32_0 : i32, i32
  }
  func.func @transform_3(%arg0: i32, %arg1: memref<1xi32, #tpu.memory_space<smem>>) -> (i32, i32) {
    %c0_i32 = arith.constant 0 : i32
    %c0_i32_0 = arith.constant 0 : i32
    %c0_i32_1 = arith.constant 0 : i32
    return %c0_i32, %c0_i32_0 : i32, i32
  }
  func.func @transform_4(%arg0: i32, %arg1: memref<1xi32, #tpu.memory_space<smem>>) -> (i32, i32) {
    %c0_i32 = arith.constant 0 : i32
    %c0_i32_0 = arith.constant 0 : i32
    %c0_i32_1 = arith.constant 0 : i32
    return %c0_i32, %c0_i32_0 : i32, i32
  }
  func.func @transform_5(%arg0: i32, %arg1: memref<1xi32, #tpu.memory_space<smem>>) -> (i32, i32) {
    %c0_i32 = arith.constant 0 : i32
    %c0_i32_0 = arith.constant 0 : i32
    return %arg0, %c0_i32 : i32, i32
  }
}

</mosaic_0001>

<bundles_post_ra>
// kernel: tpu_custom_call.1
= control target key start
LH: loop header
LB: loop body
LE: loop exit
PB: predicated region body
PF: predicated region fallthrough
CT: control target
= control target key end

     0   :  { %12 = vsyncpa [#allocation5], 0  ;;  %s708_s0 = inlined_call_operand.<no memory space> [shape: s32[1], index: 0, kind: input, shape index: {}]   ;;  %s709_s1 = inlined_call_operand.hbm [shape: f32[2,8,128], index: 1, kind: input, shape index: {}]   ;;  %s710_s2 = inlined_call_operand.vmem [shape: f32[2,56], index: 2, kind: input, shape index: {}]   ;;  %s711_s3 = inlined_call_operand.hbm [shape: bf16[128,128], index: 3, kind: input, shape index: {}]   ;;  %s712_s4 = inlined_call_operand.hbm [shape: bf16[56,128], index: 4, kind: input, shape index: {}]   ;;  %s713_s5 = inlined_call_operand.vmem [shape: f32[1,128], index: 5, kind: input, shape index: {}]   ;;  %s714_s6 = inlined_call_operand.hbm [shape: f32[2,128], index: 6, kind: output, shape index: {}]  }
   0x1   :  { %13 = vsyncpa [#allocation8], 0 }
   0x2   :  { %14 = vsyncpa [#allocation6], 0  ;;  %s631_s21 = smov [#allocation7]  }
   0x3   :  { %s34_s22 = sshll.u32 %s631_s21, 4  ;;  %s35_s22 = int_to_ptr.vmem [resolvable:$true] %s34_s22 }
   0x4   :  { %s553_s23 = scalar_lea.vmem %s35_s22, 1024  ;;  %p558_p1 = scmp.lt.s32.totalorder %s35_s22, %s35_s22 }
   0x5   :  { %p554_p0 = scmp.ne.s32.totalorder %s35_s22, %s553_s23  ;;  %p559_p2 = scmp.lt.s32.totalorder %s553_s23, %s553_s23 }
   0x7   :  { %p560_p3 = por %p559_p2, %p558_p1 }
   0x9   :  { %p561_p4 = pnand %p560_p3, %p554_p0 }
   0xb   :  { %564 = shalt.err (!%p561_p4)
}
   0xc   :  { %s632_s24 = smov 64   ;;  %s633_s25 = smov 4  }
   0xd   :  { %40 = dma.hbm_to_vmem [thread:$0]  %s711_s3, 1024, %s35_s22, [#allocation8], %s632_s24, %s632_s24, %s633_s25  }
   0xe   :  { %s634_s28 = smov [#allocation4]  }
   0xf   :  { %s20_s29 = sshll.u32 %s634_s28, 4  ;;  %s21_s29 = int_to_ptr.vmem [resolvable:$true] %s20_s29 }
  0x10   :  { %s573_s30 = scalar_lea.vmem %s21_s29, 256  ;;  %p578_p6 = scmp.lt.s32.totalorder %s21_s29, %s21_s29 }
  0x11   :  { %p574_p5 = scmp.ne.s32.totalorder %s21_s29, %s573_s30  ;;  %p579_p7 = scmp.lt.s32.totalorder %s573_s30, %s573_s30 }
  0x13   :  { %p580_p8 = por %p579_p7, %p578_p6 }
  0x15   :  { %p581_p9 = pnand %p580_p8, %p574_p5 }
  0x17   :  { %584 = shalt.err (!%p581_p9)
}
  0x18   :  { %s635_s7 = smov 128   ;;  %s636_s8 = smov 8  }
  0x19   :  { %26 = dma.hbm_to_vmem [thread:$0]  %s709_s1, 256, %s21_s29, [#allocation5], %s635_s7, %s635_s7, %s636_s8  }
  0x1a   :  { %s637_s11 = smov [#allocation9]  }
  0x1b   :  { %s46_s12 = sshll.u32 %s637_s11, 4  ;;  %s47_s12 = int_to_ptr.vmem [resolvable:$true] %s46_s12 }
  0x1c   :  { %s593_s3 = scalar_lea.vmem %s47_s12, 448  ;;  %p598_p11 = scmp.lt.s32.totalorder %s47_s12, %s47_s12 }
  0x1d   :  { %p594_p10 = scmp.ne.s32.totalorder %s47_s12, %s593_s3  ;;  %p599_p12 = scmp.lt.s32.totalorder %s593_s3, %s593_s3 }
  0x1f   :  { %p600_p13 = por %p599_p12, %p598_p11 }
  0x21   :  { %p601_p0 = pnand %p600_p13, %p594_p10 }
  0x23   :  { %604 = shalt.err (!%p601_p0)
}
  0x24   :  { %52 = dma.hbm_to_vmem [thread:$0]  %s712_s4, 448, %s47_s12, [#allocation8], %s632_s24, %s632_s24, %s633_s25  }
  0x25   :  { %625 = dma.done.wait [#allocation5], 256  }
  0x26   :  { %626 = vsyncadd [#allocation5], 4294967040 }
  0x27   :  { %627 = dma.done.wait [#allocation8], 1472  }
  0x28   :  { %628 = vsyncadd [#allocation8], 4294965824  ;;  %v638_v0 = vmov 0.0   ;;  %vm639_vm0 = vmmov 0   ;;  %v445_v1 = vld [vmem:[#allocation7 + $0x38] sm:$0xff]   ;;  %v444_v2 = vld [vmem:[#allocation7 + $0x30] sm:$0xff]   ;;  %v266_v41 = vlaneseq }
  0x29   :  { %509 = vmatprep.subr.mxu1 %v638_v0  ;;  %523 = vmatprep.mubr.msk.f32.mxu1 %vm639_vm0, %v638_v0  ;;  %v425_v3 = vunpack.c.l.bf16 %v445_v1  ;;  %v426_v4 = vunpack.c.h.bf16 %v445_v1  ;;  %v104_v5 = vld [vmem:[#allocation9 + $0x18] sm:$0xf]  ;;  %v447_v6 = vld [vmem:[#allocation9 + $0x10] sm:$0xff]   ;;  %v422_v8 = vunpack.c.h.bf16 %v444_v2  ;;  %v446_v10 = vld [vmem:[#allocation9 + $0x8] sm:$0xff]   ;;  %v421_v13 = vunpack.c.l.bf16 %v444_v2 }
  0x2a   :  { %v111_v7 = vunpack.c.l.bf16 %v104_v5  ;;  %v438_v9 = vunpack.c.h.bf16 %v447_v6  ;;  %v443_v11 = vld [vmem:[#allocation7 + $0x28] sm:$0xff]   ;;  %v437_v12 = vunpack.c.l.bf16 %v447_v6  ;;  %v434_v14 = vunpack.c.h.bf16 %v446_v10  ;;  %v428_v16 = vld [vmem:[#allocation9] sm:$0xff]   ;;  %v441_v22 = vld [vmem:[#allocation7 + $0x18] sm:$0xff]  }
  0x2b   :  { %474 = vmatprep.subr.mxu0 %v426_v4  ;;  %v418_v15 = vunpack.c.h.bf16 %v443_v11  ;;  %v442_v17 = vld [vmem:[#allocation7 + $0x20] sm:$0xff]   ;;  %v433_v18 = vunpack.c.l.bf16 %v446_v10  ;;  %v417_v19 = vunpack.c.l.bf16 %v443_v11  ;;  %v430_v20 = vunpack.c.h.bf16 %v428_v16  ;;  %v187_v25 = vld [vmem:[%s710_s2] sm:$0x3]  ;;  %v439_v31 = vld [vmem:[#allocation7 + $0x8] sm:$0xff]  }
  0x2c   :  { %475 = vmatpush3.msra.mxu0 %v426_v4  ;;  %510 = vmatpush3.msra.mxu1 %v111_v7  ;;  %v414_v21 = vunpack.c.h.bf16 %v442_v17  ;;  %v429_v23 = vunpack.c.l.bf16 %v428_v16  ;;  %v413_v24 = vunpack.c.l.bf16 %v442_v17  ;;  %vm188_vm1 = vcmask 457728   ;;  %v689_v27 = vld [vmem:[#allocation4] sm:$0xff]  ;;  %v396_v34 = vld [vmem:[#allocation7] sm:$0xff]   ;;  %v692_v38 = vld [vmem:[#allocation4 + $0x8] sm:$0xff] }
  0x2d   :  { %476 = vmatprep.subr.mxu0 %v425_v3  ;;  %511 = vmatprep.subr.mxu1 %v638_v0  ;;  %v410_v26 = vunpack.c.h.bf16 %v441_v22  ;;  %v440_v28 = vld [vmem:[#allocation7 + $0x10] sm:$0xff]   ;;  %v409_v29 = vunpack.c.l.bf16 %v441_v22  ;;  %v402_v33 = vunpack.c.h.bf16 %v439_v31  ;;  %v401_v35 = vunpack.c.l.bf16 %v439_v31 }
  0x2e   :  { %477 = vmatpush3.msra.mxu0 %v425_v3  ;;  %512 = vmatpush3.msra.mxu1 %v438_v9  ;;  %v406_v30 = vunpack.c.h.bf16 %v440_v28  ;;  %v405_v32 = vunpack.c.l.bf16 %v440_v28  ;;  %v398_v36 = vunpack.c.h.bf16 %v396_v34  ;;  %v397_v37 = vunpack.c.l.bf16 %v396_v34  ;;  %v394_v59 = vld [vmem:[%s713_s5] ss:$0 sm:$0xff] }
  0x2f   :  { %478 = vmatprep.subr.mxu0 %v422_v8  ;;  %513 = vmatprep.subr.mxu1 %v638_v0  ;;  %v640_v39 = vmov 1966171168   ;;  %v267_v43 = vshrl.u32 %v266_v41, 7  ;;  %v313_v63 = vand.u32 127, %v266_v41  ;;  %v315_v2 = vstv %s708_s0  ;;  %s641_s0 = smov [#allocation10]  }
  0x30   :  { %479 = vmatpush3.msra.mxu0 %v422_v8  ;;  %514 = vmatpush3.msra.mxu1 %v437_v12  ;;  %v264_v40 = vunpack.c.l.s4 %v640_v39  ;;  %vm327_vm2 = vcmask 1041409   ;;  %vm331_vm4 = vcmask 58368   ;;  %s383_s5 = sshll.u32 %s641_s0, 4  ;;  %s384_s5 = int_to_ptr.vmem [resolvable:$true] %s383_s5 }
  0x31   :  { %480 = vmatprep.subr.mxu0 %v421_v13  ;;  %515 = vmatprep.subr.mxu1 %v638_v0  ;;  %v287_v51 = vsub.s32 0, %v267_v43  ;;  %v321_v1 = vsub.s32 %v313_v63, %v267_v43  ;;  %vm316_vm3 = vcmp.lt.s32.totalorder %v313_v63, %v315_v2  ;;  %v353_v16 = vsub.s32 1, %v267_v43  ;;  %s605_s18 = scalar_lea.vmem %s384_s5, 32  ;;  %p610_p2 = scmp.lt.s32.totalorder %s384_s5, %s384_s5 }
  0x32   :  { %481 = vmatpush3.msra.mxu0 %v421_v13  ;;  %516 = vmatpush3.msra.mxu1 %v434_v14  ;;  %v265_v42 = vunpack.c.0.s8 %v264_v40  ;;  %p606_p1 = scmp.ne.s32.totalorder %s384_s5, %s605_s18  ;;  %p611_p3 = scmp.lt.s32.totalorder %s605_s18, %s605_s18 }
  0x33   :  { %482 = vmatprep.subr.mxu0 %v418_v15  ;;  %517 = vmatprep.subr.mxu1 %v638_v0 }
  0x34   :  { %483 = vmatpush3.msra.mxu0 %v418_v15  ;;  %518 = vmatpush3.msra.mxu1 %v433_v18  ;;  %v268_v45 = vsub.s32 %v265_v42, %v267_v43  ;;  %p612_p4 = por %p611_p3, %p610_p2 }
  0x35   :  { %484 = vmatprep.subr.mxu0 %v417_v19  ;;  %519 = vmatprep.subr.mxu1 %v638_v0 }
  0x36   :  { %485 = vmatpush3.msra.mxu0 %v417_v19  ;;  %520 = vmatpush3.msra.mxu1 %v430_v20  ;;  %p613_p5 = pnand %p612_p4, %p606_p1 }
  0x37   :  { %486 = vmatprep.subr.mxu0 %v414_v21  ;;  %521 = vmatprep.subr.mxu1 %v638_v0 }
  0x38   :  { %487 = vmatpush3.msra.mxu0 %v414_v21  ;;  %522 = vmatpush3.msra.mxu1 %v429_v23 }
  0x39   :  { %488 = vmatprep.subr.mxu0 %v413_v24  ;;  %524 = vmatmul.mubr.msk.f32.vlgmr.msra.gmra.mxu1 %vm188_vm1, %v187_v25 }
  0x3a   :  { %489 = vmatpush3.msra.mxu0 %v413_v24  ;;  %506 = vmatprep.mubr.f32.mxu0 %v689_v27 }
  0x3b   :  { %490 = vmatprep.subr.mxu0 %v410_v26 }
  0x3c   :  { %491 = vmatpush3.msra.mxu0 %v410_v26 }
  0x3d   :  { %492 = vmatprep.subr.mxu0 %v409_v29 }
  0x3e   :  { %493 = vmatpush3.msra.mxu0 %v409_v29 }
  0x3f   :  { %494 = vmatprep.subr.mxu0 %v406_v30 }
  0x40   :  { %495 = vmatpush3.msra.mxu0 %v406_v30 }
  0x41   :  { %496 = vmatprep.subr.mxu0 %v405_v32 }
  0x42   :  { %497 = vmatpush3.msra.mxu0 %v405_v32 }
  0x43   :  { %498 = vmatprep.subr.mxu0 %v402_v33 }
  0x44   :  { %499 = vmatpush3.msra.mxu0 %v402_v33 }
  0x45   :  { %500 = vmatprep.subr.mxu0 %v401_v35 }
  0x46   :  { %501 = vmatpush3.msra.mxu0 %v401_v35 }
  0x47   :  { %502 = vmatprep.subr.mxu0 %v398_v36 }
  0x48   :  { %503 = vmatpush3.msra.mxu0 %v398_v36 }
  0x49   :  { %504 = vmatprep.subr.mxu0 %v397_v37 }
  0x4a   :  { %505 = vmatpush3.msra.mxu0 %v397_v37 }
  0x4b   :  { %507 = vmatmul.mubr.f32.vlgmr.msra.gmra.mxu0 %v692_v38 }
  0xf9   :  { %v258_v44 = vpop.f32.mrf.mxu1 }
  0xfa   :  { %v269_v47 = vrot.slane %v258_v44, %v268_v45 }
  0xfb   :  { %v525_v46 = vpop.f32.mrf.mxu1 }
  0xfc   :  { %v270_v48 = vcombine.high %v269_v47, %v269_v47  ;;  %v277_v49 = vrot.slane %v269_v47, %v268_v45 }
  0xfe   :  { %v284_v50 = vrot.slane %v270_v48, %v268_v45  ;;  %v288_v53 = vrot.slane %v277_v49, %v287_v51 }
 0x100   :  { %v292_v52 = vrot.slane %v284_v50, %v287_v51 }
 0x10b   :  { %v508_v54 = vpop.f32.mrf.mxu0 }
 0x10c   :  { %v296_v56 = vadd.f32 %v508_v54, %v292_v52 }
 0x10d   :  { %v178_v55 = vpop.f32.mrf.mxu0 }
 0x10e   :  { %v295_v57 = vadd.f32 %v288_v53, %v178_v55 }
 0x110   :  { %537 = vtanh.f32 %v295_v57 }
 0x111   :  { %539 = vtanh.f32 %v296_v56 }
 0x11d   :  { %v538_v58 = vpop.eup %537 }
 0x11e   :  { %v306_v60 = vmul.f32 %v538_v58, %v394_v59  ;;  %v540_v61 = vpop.eup %539 }
 0x11f   :  { %v307_v62 = vmul.f32 %v540_v61, %v394_v59 }
 0x120   :  { %308 = vadd.xlane.f32.xlu0 %v306_v60 }
 0x124   :  { %310 = vadd.xlane.f32.xlu0 %v307_v62 }
 0x1a9   :  { %v309_v0 = vpop.xlane.xlu0 %308 }
 0x1aa   :  { %v322_v4 = vrot.slane %v309_v0, %v321_v1 }
 0x1ad   :  { %v311_v3 = vpop.xlane.xlu0 %310 }
 0x1ae   :  { %v326_v5 = vrot.slane %v311_v3, %v321_v1 }
 0x1b0   :  { %v328_v6 = vsel %vm327_vm2, %v326_v5, %v322_v4 }
 0x1b1   :  { %v330_v7 = vsel %vm316_vm3, %v328_v6, -1e+30 }
 0x1b2   :  { %v332_v8 = vsel %vm331_vm4, %v330_v7, -inf }
 0x1b3   :  { %333 = vmax.xlane.f32.xlu1 %v332_v8 }
 0x23c   :  { %v334_v9 = vpop.xlane.xlu1 %333 }
 0x23d   :  { %v335_v10 = vsub.f32 %v330_v7, %v334_v9 }
 0x23f   :  { %v336_v11 = vmul.f32 1.442695, %v335_v10 }
 0x241   :  { %541 = vpow2.f32 %v336_v11 }
 0x24e   :  { %v542_v12 = vpop.eup %541 }
 0x24f   :  { %v338_v13 = vsel %vm316_vm3, %v542_v12, 0.0 }
 0x250   :  { %v339_v14 = vsel %vm331_vm4, %v338_v13, 0.0 }
 0x251   :  { %340 = vadd.xlane.f32.xlu1 %v339_v14 }
 0x2da   :  { %v341_v15 = vpop.xlane.xlu1 %340 }
 0x2db   :  { %543 = vrcp.f32 %v341_v15 }
 0x2e8   :  { %v544_v17 = vpop.eup %543 }
 0x2e9   :  { %v343_v18 = vmul.f32 %v544_v17, %v338_v13 }
 0x2eb   :  { %v354_v19 = vrot.slane %v343_v18, %v353_v16  ;;  %v347_v20 = vrot.slane %v343_v18, %v287_v51 }
 0x2ed   :  { %356 = vbcast.lane.b32.xlu1 %v354_v19, 256  ;;  %349 = vbcast.lane.b32.xlu0 %v347_v20, 256 }
 0x35f   :  { %v357_v21 = vpop.permute.xlu1 %356  ;;  %v350_v22 = vpop.permute.xlu0 %349 }
 0x360   :  { %v359_v23 = vmul.f32 %v357_v21, %v692_v38  ;;  %v358_v24 = vmul.f32 %v350_v22, %v689_v27 }
 0x362   :  { %v366_v25 = vrot.slane %v359_v23, 4  ;;  %v360_v26 = vrot.slane %v358_v24, 4 }
 0x364   :  { %v367_v28 = vadd.f32 %v366_v25, %v359_v23  ;;  %v361_v29 = vadd.f32 %v360_v26, %v358_v24 }
 0x366   :  { %v368_v30 = vrot.slane %v367_v28, 2  ;;  %v362_v31 = vrot.slane %v361_v29, 2 }
 0x368   :  { %v369_v32 = vadd.f32 %v368_v30, %v367_v28  ;;  %v363_v33 = vadd.f32 %v362_v31, %v361_v29 }
 0x36a   :  { %v370_v34 = vrot.slane %v369_v32, 1  ;;  %v364_v35 = vrot.slane %v363_v33, 1 }
 0x36c   :  { %v371_v36 = vadd.f32 %v370_v34, %v369_v32  ;;  %v365_v37 = vadd.f32 %v364_v35, %v363_v33 }
 0x36e   :  { %v374_v39 = vsel %vm327_vm2, %v371_v36, %v365_v37 }
 0x36f   :  { %376 = vst [vmem:[#allocation10] sm:$0x3] %v374_v39 }
 0x370   :  { %616 = shalt.err (!%p613_p5)
}
 0x371   :  { %386 = dma.vmem_to_hbm [thread:$0]  %s384_s5, 32, %s714_s6, [#allocation6]  }
 0x372   :  { %629 = dma.done.wait [#allocation6], 32  }
 0x373   :  { %630 = vsyncadd [#allocation6], 4294967264 }
 0x374   :  { %390 = vsyncpa [#allocation5], 1 }
 0x375   :  { %391 = vsyncpa [#allocation8], 1 }
 0x376   :  { %392 = vsyncpa [#allocation6], 1 }

</bundles_post_ra>
